<compile_context>
chip_gen: v5e
topology: v5e:2x2
jax: 0.10.0
libtpu: 0.0.40
codegen_flags: <defaults>
</compile_context>

<pallas_src>
import functools

import jax
import jax.numpy as jnp
from jax.experimental import pallas as pl
from jax.experimental.pallas import tpu as pltpu


def _mlp_kernel(x_ref, w_ref, b_ref, o_ref):
    # x_ref: (1, C, tm)  channel-major slab of tokens (fused transpose input)
    # w_ref: (C, E)      resident weight
    # b_ref: (1, E)      resident bias
    # o_ref: (1, tm, E)  token-major output tile
    x_ct = x_ref[0]                                   # (C, tm)
    # Contract over channels (dim 0 of both operands): (C, tm) x (C, E) -> (tm, E).
    # The "transpose" happens inside the MXU feed; no HBM transpose needed.
    acc = jax.lax.dot_general(
        x_ct,
        w_ref[...],
        dimension_numbers=(((0,), (0,)), ((), ())),
        preferred_element_type=jnp.float32,
    )
    o_ref[0] = (acc + b_ref[...]).astype(o_ref.dtype)


def segformer_mlp(x_nchw, weight, bias, *, tm=512):
    """SegFormer MLP forward.

    x_nchw: (B, C, H, W); weight: (E, C) torch-style Linear weight; bias: (E,).
    Returns (B, H*W, E).
    """
    B, C, H, W = x_nchw.shape
    E = weight.shape[0]
    HW = H * W

    # Free reshapes only — NO wrapper-side transpose of the activation.
    x3d = x_nchw.reshape(B, C, HW)        # same HBM layout as NCHW
    w = weight.T                          # (C, E), tiny (<= ~1.5 MiB for SegFormer)
    b = bias.reshape(1, E)                # (1, E)

    # ---- Row (token) tile selection ----------------------------------------
    # tm must be a multiple of 128 (it is the lane dim of the x block) or the
    # full HW extent.
    if HW >= tm:
        tm_eff = tm
    elif HW >= 128:
        tm_eff = (HW // 128) * 128
    else:
        tm_eff = HW                       # block == full dim is always legal
    n_tiles = pl.cdiv(HW, tm_eff)

    # Keep at least 2 grid steps when possible so both v7x TensorCores get work.
    if B * n_tiles < 2 and tm_eff >= 256 and tm_eff % 256 == 0:
        tm_eff //= 2
        n_tiles = pl.cdiv(HW, tm_eff)

    itemsize = jnp.dtype(x_nchw.dtype).itemsize
    cost = pl.CostEstimate(
        flops=2 * B * HW * C * E,
        transcendentals=0,
        bytes_accessed=itemsize * (B * HW * C + C * E + E + B * HW * E),
    )

    out = pl.pallas_call(
        _mlp_kernel,
        out_shape=jax.ShapeDtypeStruct((B, HW, E), x_nchw.dtype),
        grid_spec=pltpu.PrefetchScalarGridSpec(
            num_scalar_prefetch=0,
            grid=(B, n_tiles),
            in_specs=[
                # (C, tm) channel-major token slab; partial last tile is padded.
                pl.BlockSpec((1, C, tm_eff), lambda bi, j: (bi, 0, j)),
                # Weight / bias: constant index maps -> stay resident in VMEM.
                pl.BlockSpec((C, E), lambda bi, j: (0, 0)),
                pl.BlockSpec((1, E), lambda bi, j: (0, 0)),
            ],
            out_specs=pl.BlockSpec((1, tm_eff, E), lambda bi, j: (bi, j, 0)),
        ),
        compiler_params=pltpu.CompilerParams(
            dimension_semantics=("parallel", "parallel"),
        ),
        cost_estimate=cost,
    )(x3d, w, b)

    return out


if __name__ == "__main__":
    # Small shapes consistent with the module: input_dim=C=32, embed_dim=E=64.
    B, C, H, W = 2, 32, 16, 16
    E = 64

    key = jax.random.PRNGKey(0)
    kx, kw, kb = jax.random.split(key, 3)
    x = jax.random.normal(kx, (B, C, H, W), dtype=jnp.float32)
    # torch Linear parameter shapes: weight (E, C), bias (E,)
    weight = jax.random.normal(kw, (E, C), dtype=jnp.float32) * 0.02
    bias = jax.random.normal(kb, (E,), dtype=jnp.float32) * 0.02

    out = segformer_mlp(x, weight, bias)
    out = jax.block_until_ready(out)

    # Pure-JAX reference of the PyTorch forward.
    ref = jnp.transpose(x.reshape(B, C, H * W), (0, 2, 1)) @ weight.T + bias
    assert out.shape == (B, H * W, E)
    assert jnp.allclose(out, ref, atol=1e-4, rtol=1e-4)

    # Non-128-multiple token count (real SegFormer stage, e.g. 14x14 tokens):
    # exercises the padded / masked tail block path.
    H2 = W2 = 14
    x2 = jax.random.normal(kx, (B, C, H2, W2), dtype=jnp.float32)
    out2 = jax.block_until_ready(segformer_mlp(x2, weight, bias))
    ref2 = jnp.transpose(x2.reshape(B, C, H2 * W2), (0, 2, 1)) @ weight.T + bias
    assert out2.shape == (B, H2 * W2, E)
    assert jnp.allclose(out2, ref2, atol=1e-4, rtol=1e-4)

    print("KERNEL_OK")
</pallas_src>

<mosaic_0001>
module attributes {stable_mosaic.version = 11 : i64} {
  func.func @_mlp_kernel(%arg0: i32, %arg1: i32, %arg2: memref<1x32x256xf32, #tpu.memory_space<vmem>>, %arg3: memref<32x64xf32, #tpu.memory_space<vmem>>, %arg4: memref<1x64xf32, #tpu.memory_space<vmem>>, %arg5: memref<1x256x64xf32, #tpu.memory_space<vmem>>) attributes {dimension_semantics = [#tpu.dimension_semantics<parallel>, #tpu.dimension_semantics<parallel>], iteration_bounds = array<i64: 2, 1>, scalar_prefetch = 0 : i64, scratch_operands = 0 : i64, tpu.core_type = #tpu.core_type<tc>, window_params = [{transform_indices = @transform_0, window_bounds = array<i64: 1, 32, 256>}, {pipeline_mode = #tpu.pipeline_mode<synchronous>, transform_indices = @transform_1, window_bounds = array<i64: 32, 64>}, {pipeline_mode = #tpu.pipeline_mode<synchronous>, transform_indices = @transform_2, window_bounds = array<i64: 1, 64>}, {transform_indices = @transform_3, window_bounds = array<i64: 1, 256, 64>}]} {
    %c0 = arith.constant 0 : index
    %c0_0 = arith.constant 0 : index
    %c0_1 = arith.constant 0 : index
    %0 = vector.load %arg2[%c0, %c0_0, %c0_1] : memref<1x32x256xf32, #tpu.memory_space<vmem>>, vector<1x32x256xf32>
    %1 = vector.shape_cast %0 : vector<1x32x256xf32> to vector<32x256xf32>
    %c0_2 = arith.constant 0 : index
    %c0_3 = arith.constant 0 : index
    %2 = vector.load %arg3[%c0_2, %c0_3] : memref<32x64xf32, #tpu.memory_space<vmem>>, vector<32x64xf32>
    %cst = arith.constant dense<0.000000e+00> : vector<256x64xf32>
    %3 = tpu.matmul %1, %2, %cst {dimension_numbers = #tpu.dot_dimension_numbers<[0], [0], [1], [1], [0, 1, 1, 1], [], []>} : vector<32x256xf32>, vector<32x64xf32>, vector<256x64xf32> -> vector<256x64xf32>
    %c0_4 = arith.constant 0 : index
    %c0_5 = arith.constant 0 : index
    %4 = vector.load %arg4[%c0_4, %c0_5] : memref<1x64xf32, #tpu.memory_space<vmem>>, vector<1x64xf32>
    %5 = vector.broadcast %4 : vector<1x64xf32> to vector<256x64xf32>
    %6 = arith.addf %3, %5 : vector<256x64xf32>
    %c0_6 = arith.constant 0 : index
    %c0_7 = arith.constant 0 : index
    %c0_8 = arith.constant 0 : index
    %7 = vector.load %arg5[%c0_6, %c0_7, %c0_8] : memref<1x256x64xf32, #tpu.memory_space<vmem>>, vector<1x256x64xf32>
    %8 = vector.shape_cast %7 : vector<1x256x64xf32> to vector<256x64xf32>
    %9 = vector.shape_cast %6 : vector<256x64xf32> to vector<1x256x64xf32>
    tpu.vector_store %arg5[%c0_6, %c0_7, %c0_8], %9 {strides = array<i32>} : memref<1x256x64xf32, #tpu.memory_space<vmem>>, vector<1x256x64xf32>,
    return
  }
  func.func @transform_0(%arg0: i32, %arg1: i32) -> (i32, i32, i32) {
    %c0_i32 = arith.constant 0 : i32
    %c0_i32_0 = arith.constant 0 : i32
    return %arg0, %c0_i32, %arg1 : i32, i32, i32
  }
  func.func @transform_1(%arg0: i32, %arg1: i32) -> (i32, i32) {
    %c0_i32 = arith.constant 0 : i32
    %c0_i32_0 = arith.constant 0 : i32
    %c0_i32_1 = arith.constant 0 : i32
    return %c0_i32, %c0_i32_0 : i32, i32
  }
  func.func @transform_2(%arg0: i32, %arg1: i32) -> (i32, i32) {
    %c0_i32 = arith.constant 0 : i32
    %c0_i32_0 = arith.constant 0 : i32
    %c0_i32_1 = arith.constant 0 : i32
    return %c0_i32, %c0_i32_0 : i32, i32
  }
  func.func @transform_3(%arg0: i32, %arg1: i32) -> (i32, i32, i32) {
    %c0_i32 = arith.constant 0 : i32
    %c0_i32_0 = arith.constant 0 : i32
    return %arg0, %arg1, %c0_i32 : i32, i32, i32
  }
}

</mosaic_0001>

<bundles_post_ra>
// kernel: tpu_custom_call.1
= control target key start
LH: loop header
LB: loop body
LE: loop exit
PB: predicated region body
PF: predicated region fallthrough
CT: control target
= control target key end

     0   :  { %8 = vsyncpa [#allocation3], 0  ;;  %s1198_s0 = inlined_call_operand.hbm [shape: f32[2,32,256], index: 0, kind: input, shape index: {}]   ;;  %s1199_s1 = inlined_call_operand.hbm [shape: f32[32,64], index: 1, kind: input, shape index: {}]   ;;  %s1200_s2 = inlined_call_operand.vmem [shape: f32[1,64], index: 2, kind: input, shape index: {}]   ;;  %s1201_s3 = inlined_call_operand.vmem [shape: f32[2,256,64], index: 3, kind: output, shape index: {}]  }
   0x1   :  { %10 = vsyncpa [#allocation3 + $0x1], 0 }
   0x2   :  { %11 = vsyncpa [#allocation5], 0  ;;  %s940_s12 = smov 0   ;;  %s942_s13 = smov 0  }
   0x3   :  { %s944_s14 = smov 0   ;;  %s946_s15 = smov 0  }
   0x4   :  { %s948_s16 = smov 0   ;;  %s950_s17 = smov 0  }
   0x5 LB: > { %s666_s18 = sadd.s32 4294967295, %s913_s17   ;;  %p51_p0 = scmp.ne.s32.totalorder %s897_s13, %s893_s12  ;;  %s913_s17 = sphi %s950_s17, %s17_s17   ;;  %s909_s16 = sphi %s948_s16, %s1210_s16   ;;  %s905_s15 = sphi %s946_s15, %s1209_s15   ;;  %s901_s14 = sphi %s944_s14, %s1208_s14   ;;  %s897_s13 = sphi %s942_s13, %s1207_s13   ;;  %s893_s12 = sphi %s940_s12, %s1206_s12  }
   0x6   : > { %p970_p1 = scmp.eq.s32.totalorder %s666_s18, 0  ;;  %p668_p2 = scmp.ge.s32.totalorder %s913_s17, 1 }
   0x7   : > { %p132_p3 = scmp.lt.s32.totalorder %s913_s17, 3  ;;  %s143_s23 = sshll.u32 %s1199_s1, 4  ;;  %s144_s23 = int_to_ptr.hbm [resolvable:$true] %s143_s23 }
   0x8   : > { %p978_p4 = por %p970_p1, %p51_p0  ;;  %s915_s25 = smov [#allocation4]  }
   0x9   : > { %p985_p5 = pnand %p668_p2, %p132_p3  ;;  %s145_s26 = sshll.u32 %s915_s25, 4  ;;  %s146_s26 = int_to_ptr.vmem [resolvable:$true] %s145_s26 }
   0xa   : > { %s916_s27 = smov 128   ;;  %s917_s28 = smov 8  }
   0xb   : > { %p733_p6 = pneg %p985_p5  ;;  %s29_s29 = sadd.s32 1, %s909_s16 }
   0xc   : > { %p31_p8 = scmp.ge.s32.totalorder %s29_s29, 2  ;;  %s38_s30 = sadd.s32 1, %s901_s14 }
   0xd   : > { %p734_p7 = pnand %p733_p6, %p970_p1  ;;  %p45_p9 = scmp.ne.s32.totalorder %s901_s14, %s897_s13 }
   0xe   : > { %p46_p10 = scmp.eq.s32.totalorder %s913_s17, 0  ;;  %s1212_s29 = smov (%p31_p8, %s29_s29), 0 }
   0xf   : > { %736 = dma.hbm_to_vmem [thread:$0]  (!%p734_p7), %s144_s23, 512, %s146_s26, [#allocation5], %s916_s27, %s916_s27, %s917_s28  }
  0x10   : > { %p1000_p11 = por %p46_p10, %p45_p9  ;;  %p742_p12 = scmp.lt.s32.totalorder %s913_s17, 2 }
  0x11   : > { %s33_s5 = ssub.s32 %s909_s16, %s1212_s29  ;;  %s162_s6 = sand.u32 1, %s901_s14  }
  0x12   : > { %p36_p13 = scmp.eq.s32.totalorder %s33_s5, 0  ;;  %s671_s7 = sshll.u32 %s162_s6, 6 }
  0x13   : > { %s713_s8 = sshll.u32 %s909_s16, 6  ;;  %s166_s21 = scalar_lea.vmem [#allocation2], %s671_s7 }
  0x14   : > { %s1010_s9 = scalar_select %p36_p13, %s901_s14, %s38_s30  }
  0x15   : > { %s173_s12 = scalar_lea.hbm %s1198_s0, %s713_s8  ;;  %s176_s22 = sshll.u32 %s166_s21, 4  ;;  %s177_s22 = int_to_ptr.vmem [resolvable:$true] %s176_s22 }
  0x16   : > { %s174_s18 = sshll.u32 %s173_s12, 4  ;;  %p738_p0 = pnand %p742_p12, %p1000_p11  ;;  %s175_s18 = int_to_ptr.hbm [resolvable:$true] %s174_s18 }
  0x17   : > { %s163_s23 = scalar_lea.sflag [#allocation3], %s162_s6  ;;  %s918_s25 = smov 256  }
  0x18   : > { %s919_s26 = smov 16   ;;  %188 = sbr.rel (%p985_p5) target bundleno = 453 (0x1c5), region = 32 }
  0x19   : > { %740 = dma.hbm_to_vmem [thread:$0]  (!%p738_p0), %s175_s18, 1024, %s177_s22, %s163_s23, %s918_s25, %s918_s25, %s919_s26  }
  0x1a   : > { %s190_s27 = sand.u32 (!%p985_p5), 1, %s897_s13  }
  0x1b   : > { %s675_s28 = sshll.u32 (!%p985_p5), %s190_s27, 6  ;;  %s191_s30 = scalar_lea.sflag (!%p985_p5), [#allocation3], %s190_s27 }
  0x1c   : > { %s1022_s5 = scalar_lea.vmem (!%p985_p5), [#allocation2], %s675_s28 }
  0x1d   : > { %884 = dma.done.wait (%p978_p4), %s191_s30, 1024  }
  0x1e   : > { %886 = vsyncadd (%p978_p4), %s191_s30, 4294966272 }
  0x1f   : > { %888 = dma.done.wait (%p970_p1), [#allocation5], 512  }
  0x20   : > { %890 = vsyncadd (%p970_p1), [#allocation5], 4294966784  ;;  %v239_v0 = vld [vmem:[%s1022_s5 + $0x8] sm:$0xff]  ;;  %v238_v1 = vld [vmem:[%s1022_s5] sm:$0xff]  ;;  %vm318_vm0 = vcmask 261120   ;;  %p229_p1 = scmp.lt.s32.totalorder %s905_s15, 1 }
  0x21   : > { %286 = vxpose.xlu0.b32.start [1/4] (short) %v239_v0, 128  ;;  %254 = vxpose.xlu1.b32.start [1/4] (short) %v238_v1, 128  ;;  %v249_v2 = vld [vmem:[#allocation4 + $0x18] sm:$0xff]  ;;  %v248_v3 = vld [vmem:[#allocation4 + $0x10] sm:$0xff]  ;;  %v247_v4 = vld [vmem:[#allocation4 + $0x8] sm:$0xff]  ;;  %vm528_vm1 = vcmask 523264  }
  0x22   : > { %716 = vmatpush.msra.mxu2 %v249_v2  ;;  %427 = vmatpush.msra.mxu0 %v249_v2  ;;  %v241_v5 = vld [vmem:[%s1022_s5 + $0x18] sm:$0xff]  ;;  %v240_v6 = vld [vmem:[%s1022_s5 + $0x10] sm:$0xff]  ;;  %v246_v7 = vld [vmem:[#allocation4] sm:$0xff]  ;;  %s1214_s15 = smov (!%p229_p1, %s905_s15), 1 }
  0x23   : > { %717 = vmatpush.msra.mxu3 %v249_v2  ;;  %715 = vmatpush.msra.mxu1 %v249_v2  ;;  %v243_v8 = vld [vmem:[%s1022_s5 + $0x28] sm:$0xff]  ;;  %v242_v9 = vld [vmem:[%s1022_s5 + $0x20] sm:$0xff]  ;;  %v245_v10 = vld [vmem:[%s1022_s5 + $0x38] sm:$0xff]  ;;  %s714_s19 = sshll.u32 %s1214_s15, 8 }
  0x24   : > { %719 = vmatpush.msra.mxu2 %v248_v3  ;;  %428 = vmatpush.msra.mxu0 %v248_v3  ;;  %v244_v11 = vld [vmem:[%s1022_s5 + $0x30] sm:$0xff]  ;;  %v1077_v44 = vld [vmem:[%s1200_s2] ss:$0 sm:$0xff]  ;;  %s1082_s7 = scalar_lea.vmem %s1201_s3, %s714_s19 }
  0x25   : > { %720 = vmatpush.msra.mxu3 %v248_v3  ;;  %718 = vmatpush.msra.mxu1 %v248_v3 }
  0x26   : > { %722 = vmatpush.msra.mxu2 %v247_v4  ;;  %429 = vmatpush.msra.mxu0 %v247_v4 }
  0x27   : > { %723 = vmatpush.msra.mxu3 %v247_v4  ;;  %721 = vmatpush.msra.mxu1 %v247_v4 }
  0x28   : > { %725 = vmatpush.msra.mxu2 %v246_v7  ;;  %430 = vmatpush.msra.mxu0 %v246_v7 }
  0x29   : > { %287 = vxpose.xlu0.b32.cont [2/4] (short) %v241_v5, 128  ;;  %255 = vxpose.xlu1.b32.cont [2/4] (short) %v240_v6, 128 }
  0x2a   : > { %726 = vmatpush.msra.mxu3 %v246_v7  ;;  %724 = vmatpush.msra.mxu1 %v246_v7 }
  0x31   : > { %288 = vxpose.xlu0.b32.cont [3/4] (short) %v243_v8, 128  ;;  %256 = vxpose.xlu1.b32.cont [3/4] (short) %v242_v9, 128 }
  0x39   : > { %289 = vxpose.xlu0.b32.end [4/4] (short) %v245_v10, 128  ;;  %257 = vxpose.xlu1.b32.end [4/4] (short) %v244_v11, 128 }
  0xc5   : > { %v302_v12 = vpop.trf.xlu0  ;;  %v270_v13 = vpop.trf.xlu1 }
  0xc6   : > { %695 = vmatmul.msk.f32.vlgmr.msra.gmra.mxu2 %vm318_vm0, %v302_v12  ;;  %679 = vmatmul.msk.f32.vlgmr.msra.gmra.mxu0 %vm318_vm0, %v270_v13 }
  0xcd   : > { %v303_v14 = vpop.trf.xlu0  ;;  %v271_v15 = vpop.trf.xlu1 }
  0xce   : > { %696 = vmatmul.msk.f32.gmra.mxu2 %vm318_vm0, %v303_v14  ;;  %680 = vmatmul.msk.f32.gmra.mxu0 %vm318_vm0, %v271_v15 }
  0xd5   : > { %v304_v16 = vpop.trf.xlu0  ;;  %v272_v17 = vpop.trf.xlu1 }
  0xd6   : > { %697 = vmatmul.msk.f32.gmra.mxu2 %vm318_vm0, %v304_v16  ;;  %681 = vmatmul.msk.f32.gmra.mxu0 %vm318_vm0, %v272_v17 }
  0xdd   : > { %v305_v18 = vpop.trf.xlu0  ;;  %v273_v19 = vpop.trf.xlu1 }
  0xde   : > { %698 = vmatmul.msk.f32.gmra.mxu2 %vm318_vm0, %v305_v18  ;;  %682 = vmatmul.msk.f32.gmra.mxu0 %vm318_vm0, %v273_v19 }
  0xe5   : > { %v306_v20 = vpop.trf.xlu0  ;;  %v274_v21 = vpop.trf.xlu1 }
  0xe6   : > { %699 = vmatmul.msk.f32.gmra.mxu2 %vm318_vm0, %v306_v20  ;;  %683 = vmatmul.msk.f32.gmra.mxu0 %vm318_vm0, %v274_v21 }
  0xed   : > { %v307_v22 = vpop.trf.xlu0  ;;  %v275_v23 = vpop.trf.xlu1 }
  0xee   : > { %700 = vmatmul.msk.f32.gmra.mxu2 %vm318_vm0, %v307_v22  ;;  %684 = vmatmul.msk.f32.gmra.mxu0 %vm318_vm0, %v275_v23 }
  0xf5   : > { %v308_v24 = vpop.trf.xlu0  ;;  %v276_v25 = vpop.trf.xlu1 }
  0xf6   : > { %701 = vmatmul.msk.f32.gmra.mxu2 %vm318_vm0, %v308_v24  ;;  %685 = vmatmul.msk.f32.gmra.mxu0 %vm318_vm0, %v276_v25 }
  0xfd   : > { %v309_v26 = vpop.trf.xlu0  ;;  %v277_v27 = vpop.trf.xlu1 }
  0xfe   : > { %702 = vmatmul.msk.f32.gmra.mxu2 %vm318_vm0, %v309_v26  ;;  %686 = vmatmul.msk.f32.gmra.mxu0 %vm318_vm0, %v277_v27 }
 0x105   : > { %v310_v28 = vpop.trf.xlu0  ;;  %v278_v29 = vpop.trf.xlu1 }
 0x106   : > { %703 = vmatmul.msk.f32.vlgmr.msra.gmra.mxu3 %vm318_vm0, %v310_v28  ;;  %687 = vmatmul.msk.f32.vlgmr.msra.gmra.mxu1 %vm318_vm0, %v278_v29 }
 0x10d   : > { %v311_v30 = vpop.trf.xlu0  ;;  %v279_v31 = vpop.trf.xlu1 }
 0x10e   : > { %704 = vmatmul.msk.f32.gmra.mxu3 %vm318_vm0, %v311_v30  ;;  %688 = vmatmul.msk.f32.gmra.mxu1 %vm318_vm0, %v279_v31 }
 0x115   : > { %v312_v32 = vpop.trf.xlu0  ;;  %v280_v33 = vpop.trf.xlu1 }
 0x116   : > { %705 = vmatmul.msk.f32.gmra.mxu3 %vm318_vm0, %v312_v32  ;;  %689 = vmatmul.msk.f32.gmra.mxu1 %vm318_vm0, %v280_v33 }
 0x11d   : > { %v313_v34 = vpop.trf.xlu0  ;;  %v281_v35 = vpop.trf.xlu1 }
 0x11e   : > { %706 = vmatmul.msk.f32.gmra.mxu3 %vm318_vm0, %v313_v34  ;;  %690 = vmatmul.msk.f32.gmra.mxu1 %vm318_vm0, %v281_v35 }
 0x125   : > { %v314_v36 = vpop.trf.xlu0  ;;  %v282_v37 = vpop.trf.xlu1 }
 0x126   : > { %707 = vmatmul.msk.f32.gmra.mxu3 %vm318_vm0, %v314_v36  ;;  %691 = vmatmul.msk.f32.gmra.mxu1 %vm318_vm0, %v282_v37 }
 0x12d   : > { %v315_v38 = vpop.trf.xlu0  ;;  %v283_v39 = vpop.trf.xlu1 }
 0x12e   : > { %708 = vmatmul.msk.f32.gmra.mxu3 %vm318_vm0, %v315_v38  ;;  %692 = vmatmul.msk.f32.gmra.mxu1 %vm318_vm0, %v283_v39 }
 0x135   : > { %v316_v40 = vpop.trf.xlu0  ;;  %v284_v41 = vpop.trf.xlu1 }
 0x136   : > { %709 = vmatmul.msk.f32.gmra.mxu3 %vm318_vm0, %v316_v40  ;;  %693 = vmatmul.msk.f32.gmra.mxu1 %vm318_vm0, %v284_v41 }
 0x13d   : > { %v317_v42 = vpop.trf.xlu0  ;;  %v285_v43 = vpop.trf.xlu1 }
 0x13e   : > { %710 = vmatmul.msk.f32.gmra.mxu3 %vm318_vm0, %v317_v42  ;;  %694 = vmatmul.msk.f32.gmra.mxu1 %vm318_vm0, %v285_v43 }
 0x143   : > { %v432_v45 = vpop.f32.mrf.mxu0 }
 0x144   : > { %v433_v46 = vadd.f32 %v1077_v44, %v432_v45 }
 0x146   : > { %529 = vst.msk [vmem:[%s1082_s7] sm:$0xff] %vm528_vm1, %v433_v46 }
 0x149   : > { %v480_v47 = vpop.f32.mrf.mxu2 }
 0x14a   : > { %v481_v48 = vadd.f32 %v1077_v44, %v480_v47 }
 0x14b   : > { %v435_v49 = vpop.f32.mrf.mxu0 }
 0x14c   : > { %545 = vst.msk [vmem:[%s1082_s7 + $0x80] sm:$0xff] %vm528_vm1, %v481_v48  ;;  %v436_v50 = vadd.f32 %v1077_v44, %v435_v49 }
 0x14e   : > { %530 = vst.msk [vmem:[%s1082_s7 + $0x8] sm:$0xff] %vm528_vm1, %v436_v50 }
 0x151   : > { %v483_v51 = vpop.f32.mrf.mxu2 }
 0x152   : > { %v484_v52 = vadd.f32 %v1077_v44, %v483_v51 }
 0x153   : > { %v438_v53 = vpop.f32.mrf.mxu0 }
 0x154   : > { %546 = vst.msk [vmem:[%s1082_s7 + $0x88] sm:$0xff] %vm528_vm1, %v484_v52  ;;  %v439_v54 = vadd.f32 %v1077_v44, %v438_v53 }
 0x156   : > { %531 = vst.msk [vmem:[%s1082_s7 + $0x10] sm:$0xff] %vm528_vm1, %v439_v54 }
 0x159   : > { %v486_v55 = vpop.f32.mrf.mxu2 }
 0x15a   : > { %v487_v56 = vadd.f32 %v1077_v44, %v486_v55 }
 0x15b   : > { %v441_v57 = vpop.f32.mrf.mxu0 }
 0x15c   : > { %547 = vst.msk [vmem:[%s1082_s7 + $0x90] sm:$0xff] %vm528_vm1, %v487_v56  ;;  %v442_v58 = vadd.f32 %v1077_v44, %v441_v57 }
 0x15e   : > { %532 = vst.msk [vmem:[%s1082_s7 + $0x18] sm:$0xff] %vm528_vm1, %v442_v58 }
 0x161   : > { %v489_v59 = vpop.f32.mrf.mxu2 }
 0x162   : > { %v490_v60 = vadd.f32 %v1077_v44, %v489_v59 }
 0x163   : > { %v444_v61 = vpop.f32.mrf.mxu0 }
 0x164   : > { %548 = vst.msk [vmem:[%s1082_s7 + $0x98] sm:$0xff] %vm528_vm1, %v490_v60  ;;  %v445_v62 = vadd.f32 %v1077_v44, %v444_v61 }
 0x166   : > { %533 = vst.msk [vmem:[%s1082_s7 + $0x20] sm:$0xff] %vm528_vm1, %v445_v62 }
 0x169   : > { %v492_v63 = vpop.f32.mrf.mxu2 }
 0x16a   : > { %v493_v0 = vadd.f32 %v1077_v44, %v492_v63 }
 0x16b   : > { %v447_v1 = vpop.f32.mrf.mxu0 }
 0x16c   : > { %549 = vst.msk [vmem:[%s1082_s7 + $0xa0] sm:$0xff] %vm528_vm1, %v493_v0  ;;  %v448_v2 = vadd.f32 %v1077_v44, %v447_v1 }
 0x16e   : > { %534 = vst.msk [vmem:[%s1082_s7 + $0x28] sm:$0xff] %vm528_vm1, %v448_v2 }
 0x171   : > { %v495_v3 = vpop.f32.mrf.mxu2 }
 0x172   : > { %v496_v4 = vadd.f32 %v1077_v44, %v495_v3 }
 0x173   : > { %v450_v5 = vpop.f32.mrf.mxu0 }
 0x174   : > { %550 = vst.msk [vmem:[%s1082_s7 + $0xa8] sm:$0xff] %vm528_vm1, %v496_v4  ;;  %v451_v6 = vadd.f32 %v1077_v44, %v450_v5 }
 0x176   : > { %535 = vst.msk [vmem:[%s1082_s7 + $0x30] sm:$0xff] %vm528_vm1, %v451_v6 }
 0x179   : > { %v498_v7 = vpop.f32.mrf.mxu2 }
 0x17a   : > { %v499_v8 = vadd.f32 %v1077_v44, %v498_v7 }
 0x17b   : > { %v453_v9 = vpop.f32.mrf.mxu0 }
 0x17c   : > { %551 = vst.msk [vmem:[%s1082_s7 + $0xb0] sm:$0xff] %vm528_vm1, %v499_v8  ;;  %v454_v10 = vadd.f32 %v1077_v44, %v453_v9 }
 0x17e   : > { %536 = vst.msk [vmem:[%s1082_s7 + $0x38] sm:$0xff] %vm528_vm1, %v454_v10 }
 0x181   : > { %v501_v11 = vpop.f32.mrf.mxu2 }
 0x182   : > { %v502_v12 = vadd.f32 %v1077_v44, %v501_v11 }
 0x183   : > { %v456_v13 = vpop.f32.mrf.mxu1 }
 0x184   : > { %552 = vst.msk [vmem:[%s1082_s7 + $0xb8] sm:$0xff] %vm528_vm1, %v502_v12  ;;  %v457_v14 = vadd.f32 %v1077_v44, %v456_v13 }
 0x186   : > { %537 = vst.msk [vmem:[%s1082_s7 + $0x40] sm:$0xff] %vm528_vm1, %v457_v14 }
 0x189   : > { %v504_v15 = vpop.f32.mrf.mxu3 }
 0x18a   : > { %v505_v16 = vadd.f32 %v1077_v44, %v504_v15 }
 0x18b   : > { %v459_v17 = vpop.f32.mrf.mxu1 }
 0x18c   : > { %553 = vst.msk [vmem:[%s1082_s7 + $0xc0] sm:$0xff] %vm528_vm1, %v505_v16  ;;  %v460_v18 = vadd.f32 %v1077_v44, %v459_v17 }
 0x18e   : > { %538 = vst.msk [vmem:[%s1082_s7 + $0x48] sm:$0xff] %vm528_vm1, %v460_v18 }
 0x191   : > { %v507_v19 = vpop.f32.mrf.mxu3 }
 0x192   : > { %v508_v20 = vadd.f32 %v1077_v44, %v507_v19 }
 0x193   : > { %v462_v21 = vpop.f32.mrf.mxu1 }
 0x194   : > { %554 = vst.msk [vmem:[%s1082_s7 + $0xc8] sm:$0xff] %vm528_vm1, %v508_v20  ;;  %v463_v22 = vadd.f32 %v1077_v44, %v462_v21 }
 0x196   : > { %539 = vst.msk [vmem:[%s1082_s7 + $0x50] sm:$0xff] %vm528_vm1, %v463_v22 }
 0x199   : > { %v510_v23 = vpop.f32.mrf.mxu3 }
 0x19a   : > { %v511_v24 = vadd.f32 %v1077_v44, %v510_v23 }
 0x19b   : > { %v465_v25 = vpop.f32.mrf.mxu1 }
 0x19c   : > { %555 = vst.msk [vmem:[%s1082_s7 + $0xd0] sm:$0xff] %vm528_vm1, %v511_v24  ;;  %v466_v26 = vadd.f32 %v1077_v44, %v465_v25 }
 0x19e   : > { %540 = vst.msk [vmem:[%s1082_s7 + $0x58] sm:$0xff] %vm528_vm1, %v466_v26 }
 0x1a1   : > { %v513_v27 = vpop.f32.mrf.mxu3 }
 0x1a2   : > { %v514_v28 = vadd.f32 %v1077_v44, %v513_v27 }
 0x1a3   : > { %v468_v29 = vpop.f32.mrf.mxu1 }
 0x1a4   : > { %556 = vst.msk [vmem:[%s1082_s7 + $0xd8] sm:$0xff] %vm528_vm1, %v514_v28  ;;  %v469_v30 = vadd.f32 %v1077_v44, %v468_v29 }
 0x1a6   : > { %541 = vst.msk [vmem:[%s1082_s7 + $0x60] sm:$0xff] %vm528_vm1, %v469_v30 }
 0x1a9   : > { %v516_v31 = vpop.f32.mrf.mxu3 }
 0x1aa   : > { %v517_v32 = vadd.f32 %v1077_v44, %v516_v31 }
 0x1ab   : > { %v471_v33 = vpop.f32.mrf.mxu1 }
 0x1ac   : > { %557 = vst.msk [vmem:[%s1082_s7 + $0xe0] sm:$0xff] %vm528_vm1, %v517_v32  ;;  %v472_v34 = vadd.f32 %v1077_v44, %v471_v33 }
 0x1ae   : > { %542 = vst.msk [vmem:[%s1082_s7 + $0x68] sm:$0xff] %vm528_vm1, %v472_v34 }
 0x1b1   : > { %v519_v35 = vpop.f32.mrf.mxu3 }
 0x1b2   : > { %v520_v36 = vadd.f32 %v1077_v44, %v519_v35 }
 0x1b3   : > { %v474_v37 = vpop.f32.mrf.mxu1 }
 0x1b4   : > { %558 = vst.msk [vmem:[%s1082_s7 + $0xe8] sm:$0xff] %vm528_vm1, %v520_v36  ;;  %v475_v38 = vadd.f32 %v1077_v44, %v474_v37 }
 0x1b6   : > { %543 = vst.msk [vmem:[%s1082_s7 + $0x70] sm:$0xff] %vm528_vm1, %v475_v38 }
 0x1b9   : > { %v522_v39 = vpop.f32.mrf.mxu3 }
 0x1ba   : > { %v523_v40 = vadd.f32 %v1077_v44, %v522_v39 }
 0x1bb   : > { %v477_v41 = vpop.f32.mrf.mxu1 }
 0x1bc   : > { %559 = vst.msk [vmem:[%s1082_s7 + $0xf0] sm:$0xff] %vm528_vm1, %v523_v40  ;;  %v478_v42 = vadd.f32 %v1077_v44, %v477_v41 }
 0x1be   : > { %544 = vst.msk [vmem:[%s1082_s7 + $0x78] sm:$0xff] %vm528_vm1, %v478_v42 }
 0x1c1   : > { %v525_v43 = vpop.f32.mrf.mxu3 }
 0x1c2   : > { %v526_v45 = vadd.f32 %v1077_v44, %v525_v43 }
 0x1c4   : > { %560 = vst.msk [vmem:[%s1082_s7 + $0xf8] sm:$0xff] %vm528_vm1, %v526_v45 }
 0x1c5 PF: > { %s17_s17 = sadd.s32 1, %s913_s17   ;;  %s1206_s12 = smov %s897_s13 }
 0x1c6   : > { %p14_p2 = scmp.ge.s32.totalorder %s17_s17, 4   ;;  %s1207_s13 = smov %s901_s14 }
 0x1c7   : > { %s1208_s14 = smov %s1010_s9  ;;  %s1209_s15 = smov %s909_s16 }
 0x1c8   : > { %s1210_s16 = smov %s1212_s29  ;;  %16 = sbr.rel (!%p14_p2) target bundleno = 5 (0x5), region = 76 }
 0x1cd   :  { %591 = vsyncpa [#allocation3], 1 }
 0x1ce   :  { %593 = vsyncpa [#allocation3 + $0x1], 1 }
 0x1cf   :  { %594 = vsyncpa [#allocation5], 1 }

</bundles_post_ra>
